<compile_context>
chip_gen: v7x
topology: tpu7x:2x2x1
jax: 0.10.0
libtpu: 0.0.40
codegen_flags: <defaults>
</compile_context>

<pallas_src>
import functools

import jax
import jax.numpy as jnp
from jax import lax
from jax.experimental import pallas as pl
from jax.experimental.pallas import tpu as pltpu

SUB = 16      # sublane multiple (covers the bf16 packed (16,128) tile)
LANE = 128    # lane width


def _round_up(x, m):
    return (x + m - 1) // m * m


# --------------------------------------------------------------------------
# Pass 1: fused dilated-conv3x3 as ONE bf16 matmul per row tile, emitting only
# the per-tile BN partial statistics.  The conv activation is NOT written to
# HBM (pass 2 recomputes it from the same bf16 taps tile).
#   taps_ref : (TILE_R, 9*Cin) bf16     w3_ref : (9*Cin, Cout_p) bf16
#   stats_ref: (1, 2, Cout_p)  f32      row 0 = sum, row 1 = sum of squares
# --------------------------------------------------------------------------
def _conv_stats_kernel(taps_ref, w3_ref, stats_ref):
    conv = jnp.dot(taps_ref[...], w3_ref[...],
                   preferred_element_type=jnp.float32)
    # Two slice stores: no in-VMEM concatenate / relayout per tile.
    stats_ref[0, 0:1, :] = jnp.sum(conv, axis=0, keepdims=True)
    stats_ref[0, 1:2, :] = jnp.sum(conv * conv, axis=0, keepdims=True)


# --------------------------------------------------------------------------
# Pass 2: recompute the conv tile, fused BN (scale/shift) + ReLU, add the
# residual branch (center tap of the im2col slab) and the final ReLU.
#   ss_ref : (2, Cout_p) f32   [scale ; shift]
#   taps_ref : (TILE_R, 9*Cin) bf16    w3_ref : (9*Cin, Cout_p) bf16
#   wid_ref (only if has_id) : (Cin, Cout_p) bf16
# --------------------------------------------------------------------------
def _finish_kernel(*refs, cin, pad_cols, has_id):
    if has_id:
        ss_ref, taps_ref, w3_ref, wid_ref, o_ref = refs
    else:
        ss_ref, taps_ref, w3_ref, o_ref = refs

    taps = taps_ref[...]                                     # (tile_r, 9*Cin) bf16
    conv = jnp.dot(taps, w3_ref[...], preferred_element_type=jnp.float32)
    out = jnp.maximum(conv * ss_ref[0:1, :] + ss_ref[1:2, :], 0.0)   # BN + ReLU

    center = taps[:, 4 * cin:5 * cin]                        # residual = x itself
    if has_id:
        ident = jnp.dot(center, wid_ref[...],
                        preferred_element_type=jnp.float32)
    else:
        ident = center.astype(jnp.float32)
        if pad_cols:
            ident = jnp.concatenate(
                [ident, jnp.zeros((ident.shape[0], pad_cols), jnp.float32)],
                axis=1)
    o_ref[...] = jnp.maximum(out + ident, 0.0).astype(o_ref.dtype)   # add + ReLU


def _weight_spec(shape, index_map, single_buffer):
    """Resident (constant-index) weight block; single-buffer it when requested
    to reclaim the second VMEM copy (matters most on v7x, 64 MiB/TC)."""
    if single_buffer:
        return pl.BlockSpec(shape, index_map,
                            pipeline_mode=pl.Buffered(buffer_count=1))
    return pl.BlockSpec(shape, index_map)


def _dilated_res_block_impl(x_nchw, w3_oihw, w_id_oihw, gamma, beta,
                            dilation, eps, tile_r, single_buffer_weights):
    N, Cin, H, W = x_nchw.shape
    Cout = w3_oihw.shape[0]
    d = int(dilation)
    R = N * H * W
    K = 9 * Cin
    Cout_p = _round_up(Cout, LANE)            # lane-dense output channels
    has_id = w_id_oihw is not None
    if not has_id:
        assert Cin == Cout, "plain skip connection requires inplanes == planes"

    # ---- row-tile sizing ----------------------------------------------------
    tile_r = max(SUB, (int(tile_r) // SUB) * SUB)          # sublane multiple
    tile_r = min(tile_r, _round_up(R, SUB))
    if R > SUB and _round_up(R, tile_r) // tile_r < 2:     # >= 2 tiles (v7x 2 TCs)
        tile_r = max(SUB, _round_up(-(-R // 2), SUB))

    def vmem_est(t):
        return (2 * t * K * 2                  # taps tile, bf16, double-buffered
                + 2 * t * Cout_p * 4           # output tile, f32, double-buffered
                + 2 * K * Cout_p * 2           # w3 (count 2 buffers: conservative)
                + (2 * Cin * Cout_p * 2 if has_id else 0)
                + 4 * 2 * Cout_p * 4           # stats / scale-shift blocks
                + 3 * t * Cout_p * 4)          # live f32 intermediates in the body

    while tile_r > SUB and vmem_est(tile_r) > 40 * 2**20:
        tile_r = max(SUB, ((tile_r // 2) // SUB) * SUB)

    R_p = _round_up(R, tile_r)
    num_tiles = R_p // tile_r
    vmem_limit = int(min(48 * 2**20, max(32 * 2**20, 2 * vmem_est(tile_r))))
    cparams = pltpu.CompilerParams(
        dimension_semantics=("parallel",),     # row tiles shard across TCs (v7x)
        vmem_limit_bytes=vmem_limit)

    # ---- glue (plain JAX): NCHW -> NHWC, bf16 dilated im2col on the lanes ----
    x_nhwc = jnp.transpose(x_nchw, (0, 2, 3, 1)).astype(jnp.bfloat16)
    x_pad = jnp.pad(x_nhwc, ((0, 0), (d, d), (d, d), (0, 0)))
    taps = jnp.concatenate(
        [x_pad[:, kh * d:kh * d + H, kw * d:kw * d + W, :]
         for kh in range(3) for kw in range(3)],
        axis=-1).reshape(R, K)
    taps = jnp.pad(taps, ((0, R_p - R), (0, 0)))   # zero pad rows => zero conv,
                                                   # so BN sums stay exact (no bias)

    # conv3x3 weights OIHW -> (9*Cin, Cout_p) bf16, row index = (kh*3+kw)*Cin + i
    w3 = jnp.transpose(w3_oihw, (2, 3, 1, 0)).reshape(K, Cout)
    w3 = jnp.pad(w3.astype(jnp.bfloat16), ((0, 0), (0, Cout_p - Cout)))

    wid = None
    if has_id:
        wid = jnp.transpose(w_id_oihw[:, :, 0, 0], (1, 0)).astype(jnp.bfloat16)
        wid = jnp.pad(wid, ((0, 0), (0, Cout_p - Cout)))           # (Cin, Cout_p)

    # ---- pass 1: conv matmul + per-tile BN partial stats ---------------------
    part_stats = pl.pallas_call(
        _conv_stats_kernel,
        grid=(num_tiles,),
        in_specs=[
            pl.BlockSpec((tile_r, K), lambda i: (i, 0)),
            _weight_spec((K, Cout_p), lambda i: (0, 0), single_buffer_weights),
        ],
        out_specs=pl.BlockSpec((1, 2, Cout_p), lambda i: (i, 0, 0)),
        out_shape=jax.ShapeDtypeStruct((num_tiles, 2, Cout_p), jnp.float32),
        compiler_params=cparams,
    )(taps, w3)

    # tiny cross-tile reduction + fused BN scale/shift (training-mode stats).
    # TODO(synk): single-pass E[x^2]-E[x]^2 (clamped); switch to Welford partials
    #             if activations ever have huge means.
    stats = jnp.sum(part_stats, axis=0)                    # (2, Cout_p)
    inv_n = 1.0 / float(R)
    mean = stats[0] * inv_n
    var = jnp.maximum(stats[1] * inv_n - mean * mean, 0.0)
    gamma_p = jnp.pad(gamma.astype(jnp.float32), (0, Cout_p - Cout))
    beta_p = jnp.pad(beta.astype(jnp.float32), (0, Cout_p - Cout))
    scale = gamma_p * lax.rsqrt(var + eps)
    shift = beta_p - mean * scale
    scale_shift = jnp.stack([scale, shift], axis=0)        # (2, Cout_p) f32

    # ---- pass 2: recompute conv, BN+ReLU, add residual (center tap), ReLU ----
    kernel2 = functools.partial(_finish_kernel, cin=Cin,
                                pad_cols=Cout_p - Cin, has_id=has_id)
    in_specs2 = [
        _weight_spec((2, Cout_p), lambda i: (0, 0), single_buffer_weights),
        pl.BlockSpec((tile_r, K), lambda i: (i, 0)),
        _weight_spec((K, Cout_p), lambda i: (0, 0), single_buffer_weights),
    ]
    args2 = [scale_shift, taps, w3]
    if has_id:
        in_specs2.append(
            _weight_spec((Cin, Cout_p), lambda i: (0, 0), single_buffer_weights))
        args2.append(wid)

    out_flat = pl.pallas_call(
        kernel2,
        grid=(num_tiles,),
        in_specs=in_specs2,
        out_specs=pl.BlockSpec((tile_r, Cout_p), lambda i: (i, 0)),
        out_shape=jax.ShapeDtypeStruct((R_p, Cout_p), jnp.float32),
        compiler_params=cparams,
    )(*args2)

    out = out_flat[:R, :Cout].reshape(N, H, W, Cout)
    return jnp.transpose(out, (0, 3, 1, 2)).astype(x_nchw.dtype)   # back to NCHW


def dilated_res_block(x_nchw, w3_oihw, w_id_oihw, gamma, beta,
                      dilation=1, eps=1e-5, tile_r=1024):
    """Forward of DilatedResBlock (training-mode BatchNorm statistics)."""
    # TODO(synk): stride > 1 not implemented (module default stride=1 is used).
    try:
        return _dilated_res_block_impl(x_nchw, w3_oihw, w_id_oihw, gamma, beta,
                                       dilation, float(eps), tile_r,
                                       single_buffer_weights=True)
    except Exception:
        # pl.Buffered(1) (single-buffered resident weights) not supported by
        # this jax build -> fall back to default double-buffering.
        return _dilated_res_block_impl(x_nchw, w3_oihw, w_id_oihw, gamma, beta,
                                       dilation, float(eps), tile_r,
                                       single_buffer_weights=False)


# --------------------------------------------------------------------------
# Pure-JAX reference (PyTorch training-mode forward semantics, f32)
# --------------------------------------------------------------------------
def reference(x, w3, w_id, gamma, beta, dilation, eps=1e-5):
    conv = lax.conv_general_dilated(
        x, w3, window_strides=(1, 1),
        padding=[(dilation, dilation), (dilation, dilation)],
        rhs_dilation=(dilation, dilation),
        dimension_numbers=('NCHW', 'OIHW', 'NCHW'))
    mean = jnp.mean(conv, axis=(0, 2, 3), keepdims=True)
    var = jnp.mean((conv - mean) ** 2, axis=(0, 2, 3), keepdims=True)
    out = (conv - mean) / jnp.sqrt(var + eps)
    out = out * gamma[None, :, None, None] + beta[None, :, None, None]
    out = jnp.maximum(out, 0.0)
    if w_id is not None:
        ident = lax.conv_general_dilated(
            x, w_id, (1, 1), 'VALID',
            dimension_numbers=('NCHW', 'OIHW', 'NCHW'))
    else:
        ident = x
    return jnp.maximum(out + ident, 0.0)


if __name__ == "__main__":
    # Config 1: inplanes=4 != planes=8 -> conv1x1 identity branch, dilation 2.
    N, Cin, Cout, H, W = 2, 4, 8, 16, 16
    dilation = 2

    key = jax.random.PRNGKey(0)
    k0, k1, k2, k3, k4, k5 = jax.random.split(key, 6)
    x = jax.random.normal(k0, (N, Cin, H, W), jnp.float32)
    w3 = jax.random.normal(k1, (Cout, Cin, 3, 3), jnp.float32) * 0.1
    w_id = jax.random.normal(k2, (Cout, Cin, 1, 1), jnp.float32) * 0.1
    gamma = jax.random.uniform(k3, (Cout,), jnp.float32, 0.5, 1.5)
    beta = jax.random.normal(k4, (Cout,), jnp.float32) * 0.1

    out = jax.block_until_ready(
        dilated_res_block(x, w3, w_id, gamma, beta, dilation=dilation))
    ref = reference(x, w3, w_id, gamma, beta, dilation)
    assert out.shape == (N, Cout, H, W)
    err = float(jnp.max(jnp.abs(out - ref)))
    # bf16 MXU operands (f32 accumulation) -> loosened tolerance vs f32 reference
    assert jnp.allclose(out, ref, atol=5e-2, rtol=5e-2), f"config-1 max err {err}"

    # Config 2: inplanes == planes == 8 -> plain skip (no 1x1 matmul), dilation 1.
    C2 = 8
    x2 = jax.random.normal(k5, (N, C2, H, W), jnp.float32)
    w3b = jax.random.normal(k1, (C2, C2, 3, 3), jnp.float32) * 0.1
    gamma2 = jax.random.uniform(k3, (C2,), jnp.float32, 0.5, 1.5)
    beta2 = jax.random.normal(k4, (C2,), jnp.float32) * 0.1

    out2 = jax.block_until_ready(
        dilated_res_block(x2, w3b, None, gamma2, beta2, dilation=1))
    ref2 = reference(x2, w3b, None, gamma2, beta2, 1)
    err2 = float(jnp.max(jnp.abs(out2 - ref2)))
    assert jnp.allclose(out2, ref2, atol=5e-2, rtol=5e-2), f"config-2 max err {err2}"

    print("KERNEL_OK")
</pallas_src>

<mosaic_0001>
module attributes {stable_mosaic.version = 11 : i64} {
  func.func @_conv_stats_kernel(%arg0: i32, %arg1: memref<256x36xbf16, #tpu.memory_space<vmem>>, %arg2: memref<36x128xbf16, #tpu.memory_space<vmem>>, %arg3: memref<1x2x128xf32, #tpu.memory_space<vmem>>) attributes {dimension_semantics = [#tpu.dimension_semantics<parallel>], iteration_bounds = array<i64: 2>, scalar_prefetch = 0 : i64, scratch_operands = 0 : i64, tpu.core_type = #tpu.core_type<tc>, window_params = [{transform_indices = @transform_0, window_bounds = array<i64: 256, 36>}, {pipeline_mode = #tpu.pipeline_mode<synchronous>, transform_indices = @transform_1, window_bounds = array<i64: 36, 128>}, {transform_indices = @transform_2, window_bounds = array<i64: 1, 2, 128>}]} {
    %c0 = arith.constant 0 : index
    %c0_0 = arith.constant 0 : index
    %0 = vector.load %arg1[%c0, %c0_0] : memref<256x36xbf16, #tpu.memory_space<vmem>>, vector<256x36xbf16>
    %c0_1 = arith.constant 0 : index
    %c0_2 = arith.constant 0 : index
    %1 = vector.load %arg2[%c0_1, %c0_2] : memref<36x128xbf16, #tpu.memory_space<vmem>>, vector<36x128xbf16>
    %cst = arith.constant dense<0.000000e+00> : vector<256x128xf32>
    %2 = tpu.matmul %0, %1, %cst {dimension_numbers = #tpu.dot_dimension_numbers<[1], [0], [0], [1], [0, 0, 1, 1], [], []>} : vector<256x36xbf16>, vector<36x128xbf16>, vector<256x128xf32> -> vector<256x128xf32>
    %cst_3 = arith.constant dense<0.000000e+00> : vector<128xf32>
    %3 = vector.multi_reduction <add>, %2, %cst_3 [0] : vector<256x128xf32> to vector<128xf32>
    %4 = vector.shape_cast %3 : vector<128xf32> to vector<1x128xf32>
    %c0_4 = arith.constant 0 : index
    %c0_5 = arith.constant 0 : index
    %c0_6 = arith.constant 0 : index
    %5 = vector.load %arg3[%c0_4, %c0_5, %c0_6] : memref<1x2x128xf32, #tpu.memory_space<vmem>>, vector<1x1x128xf32>
    %6 = vector.shape_cast %5 : vector<1x1x128xf32> to vector<1x128xf32>
    %7 = vector.shape_cast %4 : vector<1x128xf32> to vector<1x1x128xf32>
    tpu.vector_store %arg3[%c0_4, %c0_5, %c0_6], %7 {strides = array<i32>} : memref<1x2x128xf32, #tpu.memory_space<vmem>>, vector<1x1x128xf32>,
    %8 = arith.mulf %2, %2 : vector<256x128xf32>
    %cst_7 = arith.constant dense<0.000000e+00> : vector<128xf32>
    %9 = vector.multi_reduction <add>, %8, %cst_7 [0] : vector<256x128xf32> to vector<128xf32>
    %10 = vector.shape_cast %9 : vector<128xf32> to vector<1x128xf32>
    %c0_8 = arith.constant 0 : index
    %c1 = arith.constant 1 : index
    %c0_9 = arith.constant 0 : index
    %11 = vector.load %arg3[%c0_8, %c1, %c0_9] : memref<1x2x128xf32, #tpu.memory_space<vmem>>, vector<1x1x128xf32>
    %12 = vector.shape_cast %11 : vector<1x1x128xf32> to vector<1x128xf32>
    %13 = vector.shape_cast %10 : vector<1x128xf32> to vector<1x1x128xf32>
    tpu.vector_store %arg3[%c0_8, %c1, %c0_9], %13 {strides = array<i32>} : memref<1x2x128xf32, #tpu.memory_space<vmem>>, vector<1x1x128xf32>,
    return
  }
  func.func @transform_0(%arg0: i32) -> (i32, i32) {
    %c0_i32 = arith.constant 0 : i32
    %c0_i32_0 = arith.constant 0 : i32
    return %arg0, %c0_i32 : i32, i32
  }
  func.func @transform_1(%arg0: i32) -> (i32, i32) {
    %c0_i32 = arith.constant 0 : i32
    %c0_i32_0 = arith.constant 0 : i32
    %c0_i32_1 = arith.constant 0 : i32
    return %c0_i32, %c0_i32_0 : i32, i32
  }
  func.func @transform_2(%arg0: i32) -> (i32, i32, i32) {
    %c0_i32 = arith.constant 0 : i32
    %c0_i32_0 = arith.constant 0 : i32
    %c0_i32_1 = arith.constant 0 : i32
    return %arg0, %c0_i32, %c0_i32_0 : i32, i32, i32
  }
}

module attributes {stable_mosaic.version = 11 : i64} {
  func.func @_conv_stats_kernel(%arg0: i32, %arg1: memref<256x36xbf16, #tpu.memory_space<vmem>>, %arg2: memref<36x128xbf16, #tpu.memory_space<vmem>>, %arg3: memref<1x2x128xf32, #tpu.memory_space<vmem>>) attributes {dimension_semantics = [#tpu.dimension_semantics<parallel>], iteration_bounds = array<i64: 2>, scalar_prefetch = 0 : i64, scratch_operands = 0 : i64, tpu.core_type = #tpu.core_type<tc>, window_params = [{transform_indices = @transform_0, window_bounds = array<i64: 256, 36>}, {pipeline_mode = #tpu.pipeline_mode<synchronous>, transform_indices = @transform_1, window_bounds = array<i64: 36, 128>}, {transform_indices = @transform_2, window_bounds = array<i64: 1, 2, 128>}]} {
    %c0 = arith.constant 0 : index
    %c0_0 = arith.constant 0 : index
    %0 = vector.load %arg1[%c0, %c0_0] : memref<256x36xbf16, #tpu.memory_space<vmem>>, vector<256x36xbf16>
    %c0_1 = arith.constant 0 : index
    %c0_2 = arith.constant 0 : index
    %1 = vector.load %arg2[%c0_1, %c0_2] : memref<36x128xbf16, #tpu.memory_space<vmem>>, vector<36x128xbf16>
    %cst = arith.constant dense<0.000000e+00> : vector<256x128xf32>
    %2 = tpu.matmul %0, %1, %cst {dimension_numbers = #tpu.dot_dimension_numbers<[1], [0], [0], [1], [0, 0, 1, 1], [], []>} : vector<256x36xbf16>, vector<36x128xbf16>, vector<256x128xf32> -> vector<256x128xf32>
    %cst_3 = arith.constant dense<0.000000e+00> : vector<128xf32>
    %3 = vector.multi_reduction <add>, %2, %cst_3 [0] : vector<256x128xf32> to vector<128xf32>
    %4 = vector.shape_cast %3 : vector<128xf32> to vector<1x128xf32>
    %c0_4 = arith.constant 0 : index
    %c0_5 = arith.constant 0 : index
    %c0_6 = arith.constant 0 : index
    %5 = vector.load %arg3[%c0_4, %c0_5, %c0_6] : memref<1x2x128xf32, #tpu.memory_space<vmem>>, vector<1x1x128xf32>
    %6 = vector.shape_cast %5 : vector<1x1x128xf32> to vector<1x128xf32>
    %7 = vector.shape_cast %4 : vector<1x128xf32> to vector<1x1x128xf32>
    tpu.vector_store %arg3[%c0_4, %c0_5, %c0_6], %7 {strides = array<i32>} : memref<1x2x128xf32, #tpu.memory_space<vmem>>, vector<1x1x128xf32>,
    %8 = arith.mulf %2, %2 : vector<256x128xf32>
    %cst_7 = arith.constant dense<0.000000e+00> : vector<128xf32>
    %9 = vector.multi_reduction <add>, %8, %cst_7 [0] : vector<256x128xf32> to vector<128xf32>
    %10 = vector.shape_cast %9 : vector<128xf32> to vector<1x128xf32>
    %c0_8 = arith.constant 0 : index
    %c1 = arith.constant 1 : index
    %c0_9 = arith.constant 0 : index
    %11 = vector.load %arg3[%c0_8, %c1, %c0_9] : memref<1x2x128xf32, #tpu.memory_space<vmem>>, vector<1x1x128xf32>
    %12 = vector.shape_cast %11 : vector<1x1x128xf32> to vector<1x128xf32>
    %13 = vector.shape_cast %10 : vector<1x128xf32> to vector<1x1x128xf32>
    tpu.vector_store %arg3[%c0_8, %c1, %c0_9], %13 {strides = array<i32>} : memref<1x2x128xf32, #tpu.memory_space<vmem>>, vector<1x1x128xf32>,
    return
  }
  func.func @transform_0(%arg0: i32) -> (i32, i32) {
    %c0_i32 = arith.constant 0 : i32
    %c0_i32_0 = arith.constant 0 : i32
    return %arg0, %c0_i32 : i32, i32
  }
  func.func @transform_1(%arg0: i32) -> (i32, i32) {
    %c0_i32 = arith.constant 0 : i32
    %c0_i32_0 = arith.constant 0 : i32
    %c0_i32_1 = arith.constant 0 : i32
    return %c0_i32, %c0_i32_0 : i32, i32
  }
  func.func @transform_2(%arg0: i32) -> (i32, i32, i32) {
    %c0_i32 = arith.constant 0 : i32
    %c0_i32_0 = arith.constant 0 : i32
    %c0_i32_1 = arith.constant 0 : i32
    return %arg0, %c0_i32, %c0_i32_0 : i32, i32, i32
  }
}

</mosaic_0001>

<bundles_post_ra>
// kernel: tpu_custom_call.1
= control target key start
LH: loop header
LB: loop body
LE: loop exit
PB: predicated region body
PF: predicated region fallthrough
CT: control target
= control target key end

     0   :  { %7 = vsyncpa [#allocation3], 0  ;;  %s1093_s0 = inlined_call_operand.vmem [shape: bf16[512,36], index: 0, kind: input, shape index: {}]   ;;  %s1094_s1 = inlined_call_operand.vmem [shape: bf16[36,128], index: 1, kind: input, shape index: {}]   ;;  %s1095_s2 = inlined_call_operand.hbm [shape: f32[2,2,128], index: 2, kind: output, shape index: {}]  }
   0x1   :  { %9 = vsyncpa [#allocation3 + $0x1], 0  ;;  %s921_s9 = smov 0   ;;  %s923_s10 = smov 0  }
   0x2   :  { %s925_s11 = smov 0   ;;  %s927_s12 = smov 0  }
   0x3 LB: > { %s671_s13 = sadd.s32 4294967295, %s903_s12   ;;  %s672_s14 = sadd.s32 4294967294, %s903_s12   ;;  %s903_s12 = sphi %s927_s12, %s1101_s12   ;;  %s899_s11 = sphi %s925_s11, %s1100_s11   ;;  %s895_s10 = sphi %s923_s10, %s1099_s10   ;;  %s891_s9 = sphi %s921_s9, %s1098_s9  }
   0x4   : > { %s944_s15 = sadd.s32 1, %s903_s12   ;;  %s69_s16 = sadd.s32 1, %s899_s11 }
   0x5   : > { %s66_s17 = ssub.s32 %s903_s12, %s944_s15  ;;  %p79_p0 = scmp.ne.s32.totalorder %s899_s11, %s895_s10 }
   0x6   : > { %p67_p1 = scmp.eq.s32.totalorder %s66_s17, 0  ;;  %p80_p2 = scmp.eq.s32.totalorder %s671_s13, 1 }
   0x7   : > { %p85_p3 = scmp.ne.s32.totalorder %s895_s10, %s891_s9  ;;  %p86_p4 = scmp.eq.s32.totalorder %s672_s14, 1 }
   0x8   : > { %s954_s18 = scalar_select %p67_p1, %s899_s11, %s69_s16  }
   0x9   : > { %p956_p5 = por %p80_p2, %p79_p0  ;;  %p960_p6 = por %p86_p4, %p85_p3 }
   0xa   : > { %p675_p7 = scmp.ge.s32.totalorder %s903_s12, 1  ;;  %p116_p8 = scmp.lt.s32.totalorder %s903_s12, 3 }
   0xc   : > { %p117_p9 = pnand %p675_p7, %p116_p8 }
   0xd   : > { %v822_v0 = vld [vmem:[%s1094_s1] sm:$0xff] (!%p117_p9)   ;;  %v823_v1 = vld [vmem:[%s1094_s1 + $0x8] sm:$0xff] (!%p117_p9)   ;;  %s972_s25 = sshll.u32 (!%p117_p9), %s671_s13, 5  ;;  %v824_v2 = vld [vmem:[%s1094_s1 + $0x10] ss:$0 sps:$4 sm:$0x33] (!%p117_p9)  }
   0xe   : > { %120 = sbr.rel (%p117_p9) target bundleno = 332 (0x14c), region = 28  ;;  %737 = vmatprep.subr.bf16.mxu0 (!%p117_p9), %v822_v0  ;;  %p139_p10 = scmp.lt.s32.totalorder (!%p117_p9), %s972_s25, 63  ;;  %775 = vmatprep.subr.bf16.mxu1 (!%p117_p9), %v822_v0  ;;  %vm326_vm0 = vcmask (!%p117_p9), 1041408   ;;  %vm277_vm1 = vcmask (!%p117_p9), 293888  }
   0xf   : > { %738 = vmatpush3.bf16.msra.mxu0 (!%p117_p9), %v822_v0  ;;  %778 = vmatpush3.bf16.msra.mxu1 (!%p117_p9), %v822_v0  ;;  %v328_v3 = vsel (!%p117_p9), %vm326_vm0, %v824_v2, 0  ;;  %s135_s5 = sand.u32 (!%p117_p9), 1, %s895_s10   ;;  %s1051_s16 = scalar_lea.hbm (!%p117_p9), %s1095_s2, %s972_s25 }
  0x10   : > { %739 = vmatprep.subr.bf16.mxu0 (!%p117_p9), %v823_v1  ;;  %776 = vmatprep.subr.bf16.mxu1 (!%p117_p9), %v823_v1  ;;  %s676_s6 = sshll.u32 (!%p117_p9), %s135_s5, 1  ;;  %s600_s17 = scalar_lea.sflag (!%p117_p9), [#allocation3], %s135_s5 }
  0x11   : > { %s137_s7 = scalar_lea.vmem (!%p117_p9), [#allocation2], %s676_s6  ;;  %s905_s22 = smov (!%p117_p9), [#allocation2]  }
  0x12   : > { %s613_s8 = sshll.u32 (!%p117_p9), %s137_s7, 4  ;;  %s845_s23 = sshll.u32 (!%p117_p9), %s905_s22, 4  ;;  %s1053_s8 = int_to_ptr.vmem [resolvable:$true] %s613_s8  ;;  %s846_s23 = int_to_ptr.vmem [resolvable:$false] %s845_s23 }
  0x13   : > { %740 = vmatpush3.bf16.msra.mxu0 (!%p117_p9), %v823_v1  ;;  %779 = vmatpush3.bf16.msra.mxu1 (!%p117_p9), %v823_v1  ;;  %s841_s21 = scalar_lea.vmem (!%p117_p9), %s1053_s8, 32  ;;  %s847_s24 = scalar_lea.vmem (!%p117_p9), %s846_s23, 64 }
  0x14   : > { %781 = vmatprep.subr.msk.bf16.mxu0 (!%p117_p9), %vm326_vm0, %v824_v2  ;;  %782 = vmatprep.subr.msk.bf16.mxu1 (!%p117_p9), %vm326_vm0, %v824_v2  ;;  %p842_p11 = scmp.ne.s32.totalorder (!%p117_p9), %s1053_s8, %s841_s21  ;;  %p848_p0 = scmp.lt.s32.totalorder (!%p117_p9), %s1053_s8, %s846_s23 }
  0x15   : > { %s140_s28 = scalar_select %p139_p10, %s972_s25, 63 }
  0x16   : > { %p843_p12 = pnand %p842_p11, %p956_p5  ;;  %p849_p1 = scmp.lt.s32.totalorder %s847_s24, %s841_s21 }
  0x17   : > { %s678_s29 = sshll.u32 %s140_s28, 2  ;;  %742 = vmatpush3.bf16.msra.mxu0 %v328_v3  ;;  %780 = vmatpush3.bf16.msra.mxu1 %v328_v3 }
  0x18   : > { %s982_s4 = scalar_lea.vmem %s1093_s0, %s678_s29  ;;  %p844_p13 = pneg %p843_p12 }
  0x19   : > { %v825_v4 = vld [vmem:[%s982_s4] sm:$0xff]   ;;  %v826_v5 = vld [vmem:[%s982_s4 + $0x8] sm:$0xff]   ;;  %v827_v6 = vld [vmem:[%s982_s4 + $0x10] sm:$0xff]   ;;  %p850_p2 = por %p849_p1, %p848_p0 }
  0x1a   : > { %743 = vmatprep.mubr.msk.bf16.mxu0 %vm277_vm1, %v825_v4  ;;  %v828_v7 = vld [vmem:[%s982_s4 + $0x18] sm:$0xff]   ;;  %v833_v8 = vld [vmem:[%s982_s4 + $0x40] sm:$0xff]   ;;  %v834_v9 = vld [vmem:[%s982_s4 + $0x48] sm:$0xff]  }
  0x1b   : > { %744 = vmatmul.mubr.msk.bf16.vlgmr.msra.gmra.mrb[0].mxu0 %vm277_vm1, %v826_v5  ;;  %759 = vmatprep.mubr.msk.bf16.mxu1 %vm277_vm1, %v833_v8  ;;  %v835_v10 = vld [vmem:[%s982_s4 + $0x50] sm:$0xff]   ;;  %v829_v11 = vld [vmem:[%s982_s4 + $0x20] sm:$0xff]   ;;  %v836_v12 = vld [vmem:[%s982_s4 + $0x58] sm:$0xff]   ;;  %p851_p3 = pnand %p850_p2, %p844_p13 }
  0x1c   : > { %747 = vmatprep.mubr.msk.bf16.mxu0 %vm277_vm1, %v827_v6  ;;  %760 = vmatmul.mubr.msk.bf16.vlgmr.msra.gmra.mrb[0].mxu1 %vm277_vm1, %v834_v9  ;;  %v837_v13 = vld [vmem:[%s982_s4 + $0x60] sm:$0xff]   ;;  %v830_v14 = vld [vmem:[%s982_s4 + $0x28] sm:$0xff]   ;;  %v831_v15 = vld [vmem:[%s982_s4 + $0x30] sm:$0xff]  }
  0x1d   : > { %763 = vmatprep.mubr.msk.bf16.mxu1 %vm277_vm1, %v835_v10  ;;  %v838_v16 = vld [vmem:[%s982_s4 + $0x68] sm:$0xff]   ;;  %v839_v17 = vld [vmem:[%s982_s4 + $0x70] sm:$0xff]   ;;  %v832_v18 = vld [vmem:[%s982_s4 + $0x38] sm:$0xff]  }
  0x1e   : > { %v840_v19 = vld [vmem:[%s982_s4 + $0x78] sm:$0xff]  }
  0x23   : > { %748 = vmatmul.mubr.msk.bf16.gmra.mrb[4].mxu0 %vm277_vm1, %v828_v7 }
  0x24   : > { %751 = vmatprep.mubr.msk.bf16.mxu0 %vm277_vm1, %v829_v11  ;;  %764 = vmatmul.mubr.msk.bf16.gmra.mrb[4].mxu1 %vm277_vm1, %v836_v12 }
  0x25   : > { %767 = vmatprep.mubr.msk.bf16.mxu1 %vm277_vm1, %v837_v13 }
  0x2b   : > { %752 = vmatmul.mubr.msk.bf16.gmra.mrb[8].mxu0 %vm277_vm1, %v830_v14 }
  0x2c   : > { %755 = vmatprep.mubr.msk.bf16.mxu0 %vm277_vm1, %v831_v15  ;;  %768 = vmatmul.mubr.msk.bf16.gmra.mrb[8].mxu1 %vm277_vm1, %v838_v16 }
  0x2d   : > { %771 = vmatprep.mubr.msk.bf16.mxu1 %vm277_vm1, %v839_v17 }
  0x33   : > { %756 = vmatmul.mubr.msk.bf16.gmra.mrb[12].mxu0 %vm277_vm1, %v832_v18 }
  0x34   : > { %772 = vmatmul.mubr.msk.bf16.gmra.mrb[12].mxu1 %vm277_vm1, %v840_v19 }
  0xee   : > { %v745_v20 = vpop.f32.mrb[0].mxu0 }
  0xef   : > { %v364_v21 = vpop.f32.mrb[1].mxu0  ;;  %v1016_v27 = vpop.f32.mrb[0].mxu1  ;;  %v531_v28 = vmul.f32 %v745_v20, %v745_v20 }
  0xf0   : > { %v746_v22 = vpop.f32.mrb[2].mxu0  ;;  %v529_v24 = vmul.f32 %v364_v21, %v364_v21  ;;  %v1018_v31 = vpop.f32.mrb[1].mxu1 }
  0xf1   : > { %v367_v23 = vpop.f32.mrb[3].mxu0  ;;  %v1020_v32 = vpop.f32.mrb[2].mxu1  ;;  %v532_v33 = vmul.f32 %v746_v22, %v746_v22 }
  0xf2   : > { %v491_v25 = vadd.f32 %v367_v23, %v364_v21  ;;  %v530_v26 = vmul.f32 %v367_v23, %v367_v23  ;;  %v1022_v37 = vpop.f32.mrb[3].mxu1 }
  0xf4   : > { %v492_v29 = vadd.f32 %v745_v20, %v491_v25  ;;  %v561_v30 = vadd.f32 %v530_v26, %v529_v24 }
  0xf6   : > { %v562_v34 = vadd.f32 %v561_v30, %v531_v28  ;;  %v749_v35 = vpop.f32.mrb[4].mxu0  ;;  %v493_v36 = vadd.f32 %v746_v22, %v492_v29 }
  0xf7   : > { %v380_v38 = vpop.f32.mrb[5].mxu0  ;;  %v1024_v47 = vpop.f32.mrb[4].mxu1  ;;  %v535_v48 = vmul.f32 %v749_v35, %v749_v35 }
  0xf8   : > { %v494_v39 = vadd.f32 %v493_v36, %v380_v38  ;;  %v533_v40 = vmul.f32 %v380_v38, %v380_v38  ;;  %v563_v41 = vadd.f32 %v562_v34, %v532_v33  ;;  %v750_v42 = vpop.f32.mrb[6].mxu0  ;;  %v444_v51 = vpop.f32.mrb[5].mxu1 }
  0xf9   : > { %v383_v43 = vpop.f32.mrb[7].mxu0  ;;  %v1026_v52 = vpop.f32.mrb[6].mxu1  ;;  %v536_v53 = vmul.f32 %v750_v42, %v750_v42 }
  0xfa   : > { %v564_v44 = vadd.f32 %v563_v41, %v533_v40  ;;  %v495_v45 = vadd.f32 %v494_v39, %v383_v43  ;;  %v534_v46 = vmul.f32 %v383_v43, %v383_v43  ;;  %v447_v57 = vpop.f32.mrb[7].mxu1  ;;  %v547_v43 = vmul.f32 %v1016_v27, %v1016_v27 }
  0xfc   : > { %v496_v49 = vadd.f32 %v749_v35, %v495_v45  ;;  %v565_v50 = vadd.f32 %v564_v44, %v534_v46  ;;  %v545_v35 = vmul.f32 %v1018_v31, %v1018_v31  ;;  %v548_v46 = vmul.f32 %v1020_v32, %v1020_v32 }
  0xfe   : > { %v566_v54 = vadd.f32 %v565_v50, %v535_v48  ;;  %v753_v55 = vpop.f32.mrb[8].mxu0  ;;  %v497_v56 = vadd.f32 %v750_v42, %v496_v49  ;;  %v546_v42 = vmul.f32 %v1022_v37, %v1022_v37 }
  0xff   : > { %v396_v58 = vpop.f32.mrb[9].mxu0  ;;  %v769_v3 = vpop.f32.mrb[8].mxu1  ;;  %v539_v4 = vmul.f32 %v753_v55, %v753_v55 }
 0x100   : > { %v498_v59 = vadd.f32 %v497_v56, %v396_v58  ;;  %v537_v60 = vmul.f32 %v396_v58, %v396_v58  ;;  %v567_v61 = vadd.f32 %v566_v54, %v536_v53  ;;  %v754_v62 = vpop.f32.mrb[10].mxu0  ;;  %v460_v7 = vpop.f32.mrb[9].mxu1  ;;  %v550_v56 = vmul.f32 %v447_v57, %v447_v57 }
 0x101   : > { %v399_v63 = vpop.f32.mrb[11].mxu0  ;;  %v770_v8 = vpop.f32.mrb[10].mxu1  ;;  %v540_v9 = vmul.f32 %v754_v62, %v754_v62 }
 0x102   : > { %v568_v0 = vadd.f32 %v567_v61, %v537_v60  ;;  %v499_v1 = vadd.f32 %v498_v59, %v399_v63  ;;  %v538_v2 = vmul.f32 %v399_v63, %v399_v63  ;;  %v463_v13 = vpop.f32.mrb[11].mxu1 }
 0x104   : > { %v500_v5 = vadd.f32 %v753_v55, %v499_v1  ;;  %v569_v6 = vadd.f32 %v568_v0, %v538_v2  ;;  %v554_v1 = vmul.f32 %v463_v13, %v463_v13  ;;  %v555_v2 = vmul.f32 %v769_v3, %v769_v3 }
 0x106   : > { %v570_v10 = vadd.f32 %v569_v6, %v539_v4  ;;  %v757_v11 = vpop.f32.mrb[12].mxu0  ;;  %v501_v12 = vadd.f32 %v754_v62, %v500_v5  ;;  %v553_v62 = vmul.f32 %v460_v7, %v460_v7  ;;  %v556_v5 = vmul.f32 %v770_v8, %v770_v8 }
 0x107   : > { %v412_v14 = vpop.f32.mrb[13].mxu0  ;;  %v773_v23 = vpop.f32.mrb[12].mxu1  ;;  %v543_v24 = vmul.f32 %v757_v11, %v757_v11 }
 0x108   : > { %v502_v15 = vadd.f32 %v501_v12, %v412_v14  ;;  %v541_v16 = vmul.f32 %v412_v14, %v412_v14  ;;  %v571_v17 = vadd.f32 %v570_v10, %v540_v9  ;;  %v758_v18 = vpop.f32.mrb[14].mxu0  ;;  %v476_v28 = vpop.f32.mrb[13].mxu1 }
 0x109   : > { %v415_v19 = vpop.f32.mrb[15].mxu0  ;;  %v774_v29 = vpop.f32.mrb[14].mxu1  ;;  %v544_v30 = vmul.f32 %v758_v18, %v758_v18  ;;  %v557_v9 = vmul.f32 %v476_v28, %v476_v28 }
 0x10a   : > { %v572_v20 = vadd.f32 %v571_v17, %v541_v16  ;;  %v503_v21 = vadd.f32 %v502_v15, %v415_v19  ;;  %v542_v22 = vmul.f32 %v415_v19, %v415_v19  ;;  %v479_v36 = vpop.f32.mrb[15].mxu1  ;;  %v560_v17 = vmul.f32 %v774_v29, %v774_v29 }
 0x10b   : > { %v558_v15 = vmul.f32 %v479_v36, %v479_v36 }
 0x10c   : > { %v504_v25 = vadd.f32 %v757_v11, %v503_v21  ;;  %v573_v26 = vadd.f32 %v572_v20, %v542_v22 }
 0x10e   : > { %v574_v33 = vadd.f32 %v573_v26, %v543_v24  ;;  %v505_v34 = vadd.f32 %v758_v18, %v504_v25 }
 0x110   : > { %v506_v38 = vadd.f32 %v505_v34, %v1018_v31  ;;  %v575_v39 = vadd.f32 %v574_v33, %v544_v30  ;;  %v549_v31 = vmul.f32 %v444_v51, %v444_v51 }
 0x112   : > { %v576_v40 = vadd.f32 %v575_v39, %v545_v35  ;;  %v507_v41 = vadd.f32 %v506_v38, %v1022_v37  ;;  %v551_v37 = vmul.f32 %v1024_v47, %v1024_v47 }
 0x114   : > { %v508_v44 = vadd.f32 %v1016_v27, %v507_v41  ;;  %v577_v45 = vadd.f32 %v576_v40, %v546_v42  ;;  %v552_v27 = vmul.f32 %v1026_v52, %v1026_v52 }
 0x116   : > { %v578_v48 = vadd.f32 %v577_v45, %v547_v43  ;;  %v509_v49 = vadd.f32 %v1020_v32, %v508_v44 }
 0x118   : > { %v510_v50 = vadd.f32 %v509_v49, %v444_v51  ;;  %v579_v53 = vadd.f32 %v578_v48, %v548_v46 }
 0x11a   : > { %v580_v54 = vadd.f32 %v579_v53, %v549_v31  ;;  %v511_v55 = vadd.f32 %v510_v50, %v447_v57 }
 0x11c   : > { %v512_v58 = vadd.f32 %v1024_v47, %v511_v55  ;;  %v581_v59 = vadd.f32 %v580_v54, %v550_v56 }
 0x11e   : > { %v582_v60 = vadd.f32 %v581_v59, %v551_v37  ;;  %v513_v61 = vadd.f32 %v1026_v52, %v512_v58  ;;  %v559_v52 = vmul.f32 %v773_v23, %v773_v23 }
 0x120   : > { %v514_v32 = vadd.f32 %v513_v61, %v460_v7  ;;  %v583_v63 = vadd.f32 %v582_v60, %v552_v27 }
 0x122   : > { %v584_v51 = vadd.f32 %v583_v63, %v553_v62  ;;  %v515_v0 = vadd.f32 %v514_v32, %v463_v13 }
 0x124   : > { %v516_v57 = vadd.f32 %v769_v3, %v515_v0  ;;  %v585_v4 = vadd.f32 %v584_v51, %v554_v1 }
 0x126   : > { %v586_v6 = vadd.f32 %v585_v4, %v555_v2  ;;  %v517_v47 = vadd.f32 %v770_v8, %v516_v57 }
 0x128   : > { %v518_v10 = vadd.f32 %v517_v47, %v476_v28  ;;  %v587_v11 = vadd.f32 %v586_v6, %v556_v5 }
 0x12a   : > { %v588_v12 = vadd.f32 %v587_v11, %v557_v9  ;;  %v519_v14 = vadd.f32 %v518_v10, %v479_v36 }
 0x12c   : > { %v520_v16 = vadd.f32 %v773_v23, %v519_v14  ;;  %v589_v7 = vadd.f32 %v588_v12, %v558_v15 }
 0x12e   : > { %v521_v18 = vadd.f32 %v774_v29, %v520_v16  ;;  %v590_v19 = vadd.f32 %v589_v7, %v559_v52 }
 0x130   : > { %v522_v13 = vrot.slane %v521_v18, 4  ;;  %v591_v20 = vadd.f32 %v590_v19, %v560_v17 }
 0x132   : > { %v523_v3 = vadd.f32 %v522_v13, %v521_v18  ;;  %v592_v21 = vrot.slane %v591_v20, 4 }
 0x134   : > { %v524_v8 = vrot.slane %v523_v3, 2  ;;  %v593_v22 = vadd.f32 %v592_v21, %v591_v20 }
 0x136   : > { %v525_v24 = vadd.f32 %v524_v8, %v523_v3  ;;  %v594_v25 = vrot.slane %v593_v22, 2 }
 0x138   : > { %v526_v26 = vrot.slane %v525_v24, 1  ;;  %v595_v28 = vadd.f32 %v594_v25, %v593_v22 }
 0x13a   : > { %v527_v23 = vadd.f32 %v526_v26, %v525_v24  ;;  %v596_v30 = vrot.slane %v595_v28, 1 }
 0x13c   : > { %528 = vst [vmem:[%s137_s7] sm:$0x1] %v527_v23  ;;  %v597_v29 = vadd.f32 %v596_v30, %v595_v28 }
 0x13e   : > { %598 = vst [vmem:[%s137_s7 + $0x1] sm:$0x1] %v597_v29 }
 0x13f   : > { %854 = shalt.err (!%p851_p3)
}
 0x140   : > { %s855_s25 = scalar_lea.hbm %s1051_s16, 32  ;;  %s859_s28 = scalar_lea.hbm %s1095_s2, 64 }
 0x141   : > { %p856_p4 = scmp.ne.s32.totalorder %s1051_s16, %s855_s25  ;;  %p860_p9 = scmp.lt.u32.totalorder %s1051_s16, %s1095_s2 }
 0x142   : > { %p861_p10 = scmp.lt.u32.totalorder %s859_s28, %s855_s25  ;;  %p863_p12 = scmp.lt.u32.totalorder %s855_s25, %s1051_s16 }
 0x143   : > { %p857_p7 = pnand %p856_p4, %p956_p5 }
 0x144   : > { %p862_p11 = por %p861_p10, %p860_p9 }
 0x145   : > { %p858_p8 = pneg %p857_p7 }
 0x146   : > { %p864_p13 = por %p863_p12, %p862_p11 }
 0x148   : > { %p865_p0 = pnand %p864_p13, %p858_p8 }
 0x14a   : > { %868 = shalt.err (!%p865_p0)
}
 0x14b   : > { %783 = dma.vmem_to_hbm [thread:$0]  (%p956_p5), %s1053_s8, 32, %s1051_s16, %s600_s17  }
 0x14c PF: > { %p789_p1 = scmp.ge.s32.totalorder %s903_s12, 2  ;;  %s625_s3 = sand.u32 1, %s891_s9  }
 0x14d   : > { %s626_s4 = scalar_lea.sflag [#allocation3], %s625_s3 }
 0x14e   : > { %p786_p2 = pnand %p789_p1, %p960_p6 }
 0x150   : > { %886 = dma.done.wait (!%p786_p2), %s626_s4, 32  }
 0x151   : > { %888 = vsyncadd (!%p786_p2), %s626_s4, 4294967264  ;;  %p12_p3 = scmp.ge.s32.totalorder %s944_s15, 4   ;;  %s1098_s9 = smov %s895_s10 }
 0x152   : > { %s1099_s10 = smov %s899_s11  ;;  %s1100_s11 = smov %s954_s18 }
 0x153   : > { %s1101_s12 = smov %s944_s15  ;;  %14 = sbr.rel (!%p12_p3) target bundleno = 3 (0x3), region = 63 }
 0x15a   :  { %631 = vsyncpa [#allocation3], 1 }
 0x15b   :  { %633 = vsyncpa [#allocation3 + $0x1], 1 }

// kernel: tpu_custom_call.1
= control target key start
LH: loop header
LB: loop body
LE: loop exit
PB: predicated region body
PF: predicated region fallthrough
CT: control target
= control target key end

     0   :  { %7 = vsyncpa [#allocation3], 0  ;;  %s1093_s0 = inlined_call_operand.vmem [shape: bf16[512,36], index: 0, kind: input, shape index: {}]   ;;  %s1094_s1 = inlined_call_operand.vmem [shape: bf16[36,128], index: 1, kind: input, shape index: {}]   ;;  %s1095_s2 = inlined_call_operand.hbm [shape: f32[2,2,128], index: 2, kind: output, shape index: {}]  }
   0x1   :  { %9 = vsyncpa [#allocation3 + $0x1], 0  ;;  %s921_s9 = smov 0   ;;  %s923_s10 = smov 0  }
   0x2   :  { %s925_s11 = smov 0   ;;  %s927_s12 = smov 0  }
   0x3 LB: > { %s671_s13 = sadd.s32 4294967295, %s903_s12   ;;  %s672_s14 = sadd.s32 4294967294, %s903_s12   ;;  %s903_s12 = sphi %s927_s12, %s1101_s12   ;;  %s899_s11 = sphi %s925_s11, %s1100_s11   ;;  %s895_s10 = sphi %s923_s10, %s1099_s10   ;;  %s891_s9 = sphi %s921_s9, %s1098_s9  }
   0x4   : > { %s944_s15 = sadd.s32 1, %s903_s12   ;;  %s69_s16 = sadd.s32 1, %s899_s11 }
   0x5   : > { %s66_s17 = ssub.s32 %s903_s12, %s944_s15  ;;  %p79_p0 = scmp.ne.s32.totalorder %s899_s11, %s895_s10 }
   0x6   : > { %p67_p1 = scmp.eq.s32.totalorder %s66_s17, 0  ;;  %p80_p2 = scmp.eq.s32.totalorder %s671_s13, 1 }
   0x7   : > { %p85_p3 = scmp.ne.s32.totalorder %s895_s10, %s891_s9  ;;  %p86_p4 = scmp.eq.s32.totalorder %s672_s14, 1 }
   0x8   : > { %s954_s18 = scalar_select %p67_p1, %s899_s11, %s69_s16  }
   0x9   : > { %p956_p5 = por %p80_p2, %p79_p0  ;;  %p960_p6 = por %p86_p4, %p85_p3 }
   0xa   : > { %p675_p7 = scmp.ge.s32.totalorder %s903_s12, 1  ;;  %p116_p8 = scmp.lt.s32.totalorder %s903_s12, 3 }
   0xc   : > { %p117_p9 = pnand %p675_p7, %p116_p8 }
   0xd   : > { %v822_v0 = vld [vmem:[%s1094_s1] sm:$0xff] (!%p117_p9)   ;;  %v823_v1 = vld [vmem:[%s1094_s1 + $0x8] sm:$0xff] (!%p117_p9)   ;;  %s972_s25 = sshll.u32 (!%p117_p9), %s671_s13, 5  ;;  %v824_v2 = vld [vmem:[%s1094_s1 + $0x10] ss:$0 sps:$4 sm:$0x33] (!%p117_p9)  }
   0xe   : > { %120 = sbr.rel (%p117_p9) target bundleno = 332 (0x14c), region = 28  ;;  %737 = vmatprep.subr.bf16.mxu0 (!%p117_p9), %v822_v0  ;;  %p139_p10 = scmp.lt.s32.totalorder (!%p117_p9), %s972_s25, 63  ;;  %775 = vmatprep.subr.bf16.mxu1 (!%p117_p9), %v822_v0  ;;  %vm326_vm0 = vcmask (!%p117_p9), 1041408   ;;  %vm277_vm1 = vcmask (!%p117_p9), 293888  }
   0xf   : > { %738 = vmatpush3.bf16.msra.mxu0 (!%p117_p9), %v822_v0  ;;  %778 = vmatpush3.bf16.msra.mxu1 (!%p117_p9), %v822_v0  ;;  %v328_v3 = vsel (!%p117_p9), %vm326_vm0, %v824_v2, 0  ;;  %s135_s5 = sand.u32 (!%p117_p9), 1, %s895_s10   ;;  %s1051_s16 = scalar_lea.hbm (!%p117_p9), %s1095_s2, %s972_s25 }
  0x10   : > { %739 = vmatprep.subr.bf16.mxu0 (!%p117_p9), %v823_v1  ;;  %776 = vmatprep.subr.bf16.mxu1 (!%p117_p9), %v823_v1  ;;  %s676_s6 = sshll.u32 (!%p117_p9), %s135_s5, 1  ;;  %s600_s17 = scalar_lea.sflag (!%p117_p9), [#allocation3], %s135_s5 }
  0x11   : > { %s137_s7 = scalar_lea.vmem (!%p117_p9), [#allocation2], %s676_s6  ;;  %s905_s22 = smov (!%p117_p9), [#allocation2]  }
  0x12   : > { %s613_s8 = sshll.u32 (!%p117_p9), %s137_s7, 4  ;;  %s845_s23 = sshll.u32 (!%p117_p9), %s905_s22, 4  ;;  %s1053_s8 = int_to_ptr.vmem [resolvable:$true] %s613_s8  ;;  %s846_s23 = int_to_ptr.vmem [resolvable:$false] %s845_s23 }
  0x13   : > { %740 = vmatpush3.bf16.msra.mxu0 (!%p117_p9), %v823_v1  ;;  %779 = vmatpush3.bf16.msra.mxu1 (!%p117_p9), %v823_v1  ;;  %s841_s21 = scalar_lea.vmem (!%p117_p9), %s1053_s8, 32  ;;  %s847_s24 = scalar_lea.vmem (!%p117_p9), %s846_s23, 64 }
  0x14   : > { %781 = vmatprep.subr.msk.bf16.mxu0 (!%p117_p9), %vm326_vm0, %v824_v2  ;;  %782 = vmatprep.subr.msk.bf16.mxu1 (!%p117_p9), %vm326_vm0, %v824_v2  ;;  %p842_p11 = scmp.ne.s32.totalorder (!%p117_p9), %s1053_s8, %s841_s21  ;;  %p848_p0 = scmp.lt.s32.totalorder (!%p117_p9), %s1053_s8, %s846_s23 }
  0x15   : > { %s140_s28 = scalar_select %p139_p10, %s972_s25, 63 }
  0x16   : > { %p843_p12 = pnand %p842_p11, %p956_p5  ;;  %p849_p1 = scmp.lt.s32.totalorder %s847_s24, %s841_s21 }
  0x17   : > { %s678_s29 = sshll.u32 %s140_s28, 2  ;;  %742 = vmatpush3.bf16.msra.mxu0 %v328_v3  ;;  %780 = vmatpush3.bf16.msra.mxu1 %v328_v3 }
  0x18   : > { %s982_s4 = scalar_lea.vmem %s1093_s0, %s678_s29  ;;  %p844_p13 = pneg %p843_p12 }
  0x19   : > { %v825_v4 = vld [vmem:[%s982_s4] sm:$0xff]   ;;  %v826_v5 = vld [vmem:[%s982_s4 + $0x8] sm:$0xff]   ;;  %v827_v6 = vld [vmem:[%s982_s4 + $0x10] sm:$0xff]   ;;  %p850_p2 = por %p849_p1, %p848_p0 }
  0x1a   : > { %743 = vmatprep.mubr.msk.bf16.mxu0 %vm277_vm1, %v825_v4  ;;  %v828_v7 = vld [vmem:[%s982_s4 + $0x18] sm:$0xff]   ;;  %v833_v8 = vld [vmem:[%s982_s4 + $0x40] sm:$0xff]   ;;  %v834_v9 = vld [vmem:[%s982_s4 + $0x48] sm:$0xff]  }
  0x1b   : > { %744 = vmatmul.mubr.msk.bf16.vlgmr.msra.gmra.mrb[0].mxu0 %vm277_vm1, %v826_v5  ;;  %759 = vmatprep.mubr.msk.bf16.mxu1 %vm277_vm1, %v833_v8  ;;  %v835_v10 = vld [vmem:[%s982_s4 + $0x50] sm:$0xff]   ;;  %v829_v11 = vld [vmem:[%s982_s4 + $0x20] sm:$0xff]   ;;  %v836_v12 = vld [vmem:[%s982_s4 + $0x58] sm:$0xff]   ;;  %p851_p3 = pnand %p850_p2, %p844_p13 }
  0x1c   : > { %747 = vmatprep.mubr.msk.bf16.mxu0 %vm277_vm1, %v827_v6  ;;  %760 = vmatmul.mubr.msk.bf16.vlgmr.msra.gmra.mrb[0].mxu1 %vm277_vm1, %v834_v9  ;;  %v837_v13 = vld [vmem:[%s982_s4 + $0x60] sm:$0xff]   ;;  %v830_v14 = vld [vmem:[%s982_s4 + $0x28] sm:$0xff]   ;;  %v831_v15 = vld [vmem:[%s982_s4 + $0x30] sm:$0xff]  }
  0x1d   : > { %763 = vmatprep.mubr.msk.bf16.mxu1 %vm277_vm1, %v835_v10  ;;  %v838_v16 = vld [vmem:[%s982_s4 + $0x68] sm:$0xff]   ;;  %v839_v17 = vld [vmem:[%s982_s4 + $0x70] sm:$0xff]   ;;  %v832_v18 = vld [vmem:[%s982_s4 + $0x38] sm:$0xff]  }
  0x1e   : > { %v840_v19 = vld [vmem:[%s982_s4 + $0x78] sm:$0xff]  }
  0x23   : > { %748 = vmatmul.mubr.msk.bf16.gmra.mrb[4].mxu0 %vm277_vm1, %v828_v7 }
  0x24   : > { %751 = vmatprep.mubr.msk.bf16.mxu0 %vm277_vm1, %v829_v11  ;;  %764 = vmatmul.mubr.msk.bf16.gmra.mrb[4].mxu1 %vm277_vm1, %v836_v12 }
  0x25   : > { %767 = vmatprep.mubr.msk.bf16.mxu1 %vm277_vm1, %v837_v13 }
  0x2b   : > { %752 = vmatmul.mubr.msk.bf16.gmra.mrb[8].mxu0 %vm277_vm1, %v830_v14 }
  0x2c   : > { %755 = vmatprep.mubr.msk.bf16.mxu0 %vm277_vm1, %v831_v15  ;;  %768 = vmatmul.mubr.msk.bf16.gmra.mrb[8].mxu1 %vm277_vm1, %v838_v16 }
  0x2d   : > { %771 = vmatprep.mubr.msk.bf16.mxu1 %vm277_vm1, %v839_v17 }
  0x33   : > { %756 = vmatmul.mubr.msk.bf16.gmra.mrb[12].mxu0 %vm277_vm1, %v832_v18 }
  0x34   : > { %772 = vmatmul.mubr.msk.bf16.gmra.mrb[12].mxu1 %vm277_vm1, %v840_v19 }
  0xee   : > { %v745_v20 = vpop.f32.mrb[0].mxu0 }
  0xef   : > { %v364_v21 = vpop.f32.mrb[1].mxu0  ;;  %v1016_v27 = vpop.f32.mrb[0].mxu1  ;;  %v531_v28 = vmul.f32 %v745_v20, %v745_v20 }
  0xf0   : > { %v746_v22 = vpop.f32.mrb[2].mxu0  ;;  %v529_v24 = vmul.f32 %v364_v21, %v364_v21  ;;  %v1018_v31 = vpop.f32.mrb[1].mxu1 }
  0xf1   : > { %v367_v23 = vpop.f32.mrb[3].mxu0  ;;  %v1020_v32 = vpop.f32.mrb[2].mxu1  ;;  %v532_v33 = vmul.f32 %v746_v22, %v746_v22 }
  0xf2   : > { %v491_v25 = vadd.f32 %v367_v23, %v364_v21  ;;  %v530_v26 = vmul.f32 %v367_v23, %v367_v23  ;;  %v1022_v37 = vpop.f32.mrb[3].mxu1 }
  0xf4   : > { %v492_v29 = vadd.f32 %v745_v20, %v491_v25  ;;  %v561_v30 = vadd.f32 %v530_v26, %v529_v24 }
  0xf6   : > { %v562_v34 = vadd.f32 %v561_v30, %v531_v28  ;;  %v749_v35 = vpop.f32.mrb[4].mxu0  ;;  %v493_v36 = vadd.f32 %v746_v22, %v492_v29 }
  0xf7   : > { %v380_v38 = vpop.f32.mrb[5].mxu0  ;;  %v1024_v47 = vpop.f32.mrb[4].mxu1  ;;  %v535_v48 = vmul.f32 %v749_v35, %v749_v35 }
  0xf8   : > { %v494_v39 = vadd.f32 %v493_v36, %v380_v38  ;;  %v533_v40 = vmul.f32 %v380_v38, %v380_v38  ;;  %v563_v41 = vadd.f32 %v562_v34, %v532_v33  ;;  %v750_v42 = vpop.f32.mrb[6].mxu0  ;;  %v444_v51 = vpop.f32.mrb[5].mxu1 }
  0xf9   : > { %v383_v43 = vpop.f32.mrb[7].mxu0  ;;  %v1026_v52 = vpop.f32.mrb[6].mxu1  ;;  %v536_v53 = vmul.f32 %v750_v42, %v750_v42 }
  0xfa   : > { %v564_v44 = vadd.f32 %v563_v41, %v533_v40  ;;  %v495_v45 = vadd.f32 %v494_v39, %v383_v43  ;;  %v534_v46 = vmul.f32 %v383_v43, %v383_v43  ;;  %v447_v57 = vpop.f32.mrb[7].mxu1  ;;  %v547_v43 = vmul.f32 %v1016_v27, %v1016_v27 }
  0xfc   : > { %v496_v49 = vadd.f32 %v749_v35, %v495_v45  ;;  %v565_v50 = vadd.f32 %v564_v44, %v534_v46  ;;  %v545_v35 = vmul.f32 %v1018_v31, %v1018_v31  ;;  %v548_v46 = vmul.f32 %v1020_v32, %v1020_v32 }
  0xfe   : > { %v566_v54 = vadd.f32 %v565_v50, %v535_v48  ;;  %v753_v55 = vpop.f32.mrb[8].mxu0  ;;  %v497_v56 = vadd.f32 %v750_v42, %v496_v49  ;;  %v546_v42 = vmul.f32 %v1022_v37, %v1022_v37 }
  0xff   : > { %v396_v58 = vpop.f32.mrb[9].mxu0  ;;  %v769_v3 = vpop.f32.mrb[8].mxu1  ;;  %v539_v4 = vmul.f32 %v753_v55, %v753_v55 }
 0x100   : > { %v498_v59 = vadd.f32 %v497_v56, %v396_v58  ;;  %v537_v60 = vmul.f32 %v396_v58, %v396_v58  ;;  %v567_v61 = vadd.f32 %v566_v54, %v536_v53  ;;  %v754_v62 = vpop.f32.mrb[10].mxu0  ;;  %v460_v7 = vpop.f32.mrb[9].mxu1  ;;  %v550_v56 = vmul.f32 %v447_v57, %v447_v57 }
 0x101   : > { %v399_v63 = vpop.f32.mrb[11].mxu0  ;;  %v770_v8 = vpop.f32.mrb[10].mxu1  ;;  %v540_v9 = vmul.f32 %v754_v62, %v754_v62 }
 0x102   : > { %v568_v0 = vadd.f32 %v567_v61, %v537_v60  ;;  %v499_v1 = vadd.f32 %v498_v59, %v399_v63  ;;  %v538_v2 = vmul.f32 %v399_v63, %v399_v63  ;;  %v463_v13 = vpop.f32.mrb[11].mxu1 }
 0x104   : > { %v500_v5 = vadd.f32 %v753_v55, %v499_v1  ;;  %v569_v6 = vadd.f32 %v568_v0, %v538_v2  ;;  %v554_v1 = vmul.f32 %v463_v13, %v463_v13  ;;  %v555_v2 = vmul.f32 %v769_v3, %v769_v3 }
 0x106   : > { %v570_v10 = vadd.f32 %v569_v6, %v539_v4  ;;  %v757_v11 = vpop.f32.mrb[12].mxu0  ;;  %v501_v12 = vadd.f32 %v754_v62, %v500_v5  ;;  %v553_v62 = vmul.f32 %v460_v7, %v460_v7  ;;  %v556_v5 = vmul.f32 %v770_v8, %v770_v8 }
 0x107   : > { %v412_v14 = vpop.f32.mrb[13].mxu0  ;;  %v773_v23 = vpop.f32.mrb[12].mxu1  ;;  %v543_v24 = vmul.f32 %v757_v11, %v757_v11 }
 0x108   : > { %v502_v15 = vadd.f32 %v501_v12, %v412_v14  ;;  %v541_v16 = vmul.f32 %v412_v14, %v412_v14  ;;  %v571_v17 = vadd.f32 %v570_v10, %v540_v9  ;;  %v758_v18 = vpop.f32.mrb[14].mxu0  ;;  %v476_v28 = vpop.f32.mrb[13].mxu1 }
 0x109   : > { %v415_v19 = vpop.f32.mrb[15].mxu0  ;;  %v774_v29 = vpop.f32.mrb[14].mxu1  ;;  %v544_v30 = vmul.f32 %v758_v18, %v758_v18  ;;  %v557_v9 = vmul.f32 %v476_v28, %v476_v28 }
 0x10a   : > { %v572_v20 = vadd.f32 %v571_v17, %v541_v16  ;;  %v503_v21 = vadd.f32 %v502_v15, %v415_v19  ;;  %v542_v22 = vmul.f32 %v415_v19, %v415_v19  ;;  %v479_v36 = vpop.f32.mrb[15].mxu1  ;;  %v560_v17 = vmul.f32 %v774_v29, %v774_v29 }
 0x10b   : > { %v558_v15 = vmul.f32 %v479_v36, %v479_v36 }
 0x10c   : > { %v504_v25 = vadd.f32 %v757_v11, %v503_v21  ;;  %v573_v26 = vadd.f32 %v572_v20, %v542_v22 }
 0x10e   : > { %v574_v33 = vadd.f32 %v573_v26, %v543_v24  ;;  %v505_v34 = vadd.f32 %v758_v18, %v504_v25 }
 0x110   : > { %v506_v38 = vadd.f32 %v505_v34, %v1018_v31  ;;  %v575_v39 = vadd.f32 %v574_v33, %v544_v30  ;;  %v549_v31 = vmul.f32 %v444_v51, %v444_v51 }
 0x112   : > { %v576_v40 = vadd.f32 %v575_v39, %v545_v35  ;;  %v507_v41 = vadd.f32 %v506_v38, %v1022_v37  ;;  %v551_v37 = vmul.f32 %v1024_v47, %v1024_v47 }
 0x114   : > { %v508_v44 = vadd.f32 %v1016_v27, %v507_v41  ;;  %v577_v45 = vadd.f32 %v576_v40, %v546_v42  ;;  %v552_v27 = vmul.f32 %v1026_v52, %v1026_v52 }
 0x116   : > { %v578_v48 = vadd.f32 %v577_v45, %v547_v43  ;;  %v509_v49 = vadd.f32 %v1020_v32, %v508_v44 }
 0x118   : > { %v510_v50 = vadd.f32 %v509_v49, %v444_v51  ;;  %v579_v53 = vadd.f32 %v578_v48, %v548_v46 }
 0x11a   : > { %v580_v54 = vadd.f32 %v579_v53, %v549_v31  ;;  %v511_v55 = vadd.f32 %v510_v50, %v447_v57 }
 0x11c   : > { %v512_v58 = vadd.f32 %v1024_v47, %v511_v55  ;;  %v581_v59 = vadd.f32 %v580_v54, %v550_v56 }
 0x11e   : > { %v582_v60 = vadd.f32 %v581_v59, %v551_v37  ;;  %v513_v61 = vadd.f32 %v1026_v52, %v512_v58  ;;  %v559_v52 = vmul.f32 %v773_v23, %v773_v23 }
 0x120   : > { %v514_v32 = vadd.f32 %v513_v61, %v460_v7  ;;  %v583_v63 = vadd.f32 %v582_v60, %v552_v27 }
 0x122   : > { %v584_v51 = vadd.f32 %v583_v63, %v553_v62  ;;  %v515_v0 = vadd.f32 %v514_v32, %v463_v13 }
 0x124   : > { %v516_v57 = vadd.f32 %v769_v3, %v515_v0  ;;  %v585_v4 = vadd.f32 %v584_v51, %v554_v1 }
 0x126   : > { %v586_v6 = vadd.f32 %v585_v4, %v555_v2  ;;  %v517_v47 = vadd.f32 %v770_v8, %v516_v57 }
 0x128   : > { %v518_v10 = vadd.f32 %v517_v47, %v476_v28  ;;  %v587_v11 = vadd.f32 %v586_v6, %v556_v5 }
 0x12a   : > { %v588_v12 = vadd.f32 %v587_v11, %v557_v9  ;;  %v519_v14 = vadd.f32 %v518_v10, %v479_v36 }
 0x12c   : > { %v520_v16 = vadd.f32 %v773_v23, %v519_v14  ;;  %v589_v7 = vadd.f32 %v588_v12, %v558_v15 }
 0x12e   : > { %v521_v18 = vadd.f32 %v774_v29, %v520_v16  ;;  %v590_v19 = vadd.f32 %v589_v7, %v559_v52 }
 0x130   : > { %v522_v13 = vrot.slane %v521_v18, 4  ;;  %v591_v20 = vadd.f32 %v590_v19, %v560_v17 }
 0x132   : > { %v523_v3 = vadd.f32 %v522_v13, %v521_v18  ;;  %v592_v21 = vrot.slane %v591_v20, 4 }
 0x134   : > { %v524_v8 = vrot.slane %v523_v3, 2  ;;  %v593_v22 = vadd.f32 %v592_v21, %v591_v20 }
 0x136   : > { %v525_v24 = vadd.f32 %v524_v8, %v523_v3  ;;  %v594_v25 = vrot.slane %v593_v22, 2 }
 0x138   : > { %v526_v26 = vrot.slane %v525_v24, 1  ;;  %v595_v28 = vadd.f32 %v594_v25, %v593_v22 }
 0x13a   : > { %v527_v23 = vadd.f32 %v526_v26, %v525_v24  ;;  %v596_v30 = vrot.slane %v595_v28, 1 }
 0x13c   : > { %528 = vst [vmem:[%s137_s7] sm:$0x1] %v527_v23  ;;  %v597_v29 = vadd.f32 %v596_v30, %v595_v28 }
 0x13e   : > { %598 = vst [vmem:[%s137_s7 + $0x1] sm:$0x1] %v597_v29 }
 0x13f   : > { %854 = shalt.err (!%p851_p3)
}
 0x140   : > { %s855_s25 = scalar_lea.hbm %s1051_s16, 32  ;;  %s859_s28 = scalar_lea.hbm %s1095_s2, 64 }
 0x141   : > { %p856_p4 = scmp.ne.s32.totalorder %s1051_s16, %s855_s25  ;;  %p860_p9 = scmp.lt.u32.totalorder %s1051_s16, %s1095_s2 }
 0x142   : > { %p861_p10 = scmp.lt.u32.totalorder %s859_s28, %s855_s25  ;;  %p863_p12 = scmp.lt.u32.totalorder %s855_s25, %s1051_s16 }
 0x143   : > { %p857_p7 = pnand %p856_p4, %p956_p5 }
 0x144   : > { %p862_p11 = por %p861_p10, %p860_p9 }
 0x145   : > { %p858_p8 = pneg %p857_p7 }
 0x146   : > { %p864_p13 = por %p863_p12, %p862_p11 }
 0x148   : > { %p865_p0 = pnand %p864_p13, %p858_p8 }
 0x14a   : > { %868 = shalt.err (!%p865_p0)
}
 0x14b   : > { %783 = dma.vmem_to_hbm [thread:$0]  (%p956_p5), %s1053_s8, 32, %s1051_s16, %s600_s17  }
 0x14c PF: > { %p789_p1 = scmp.ge.s32.totalorder %s903_s12, 2  ;;  %s625_s3 = sand.u32 1, %s891_s9  }
 0x14d   : > { %s626_s4 = scalar_lea.sflag [#allocation3], %s625_s3 }
 0x14e   : > { %p786_p2 = pnand %p789_p1, %p960_p6 }
 0x150   : > { %886 = dma.done.wait (!%p786_p2), %s626_s4, 32  }
 0x151   : > { %888 = vsyncadd (!%p786_p2), %s626_s4, 4294967264  ;;  %p12_p3 = scmp.ge.s32.totalorder %s944_s15, 4   ;;  %s1098_s9 = smov %s895_s10 }
 0x152   : > { %s1099_s10 = smov %s899_s11  ;;  %s1100_s11 = smov %s954_s18 }
 0x153   : > { %s1101_s12 = smov %s944_s15  ;;  %14 = sbr.rel (!%p12_p3) target bundleno = 3 (0x3), region = 63 }
 0x15a   :  { %631 = vsyncpa [#allocation3], 1 }
 0x15b   :  { %633 = vsyncpa [#allocation3 + $0x1], 1 }

</bundles_post_ra>
